<compile_context>
chip_gen: v7x
topology: tpu7x:2x2x1
jax: 0.10.0
libtpu: 0.0.40
codegen_flags: <defaults>
</compile_context>

<pallas_src>
import functools

import jax
import jax.numpy as jnp
from jax import lax
from jax.experimental import pallas as pl
from jax.experimental.pallas import tpu as pltpu

EPS = 1e-12          # torch.nn.functional.normalize default eps
OUT_LANES = 128      # lane-dense packed output: [mix, task_aff_sig, struct_aff_sig, 0...]


# ---------------------------------------------------------------------------
# Single fused kernel: pooling-matrix build + embed + mean-pool + L2-norm for
# target & aux, Set2Set(steps=1) readout + concat-norm, affinities, sigmoids.
# ---------------------------------------------------------------------------
def _fused_gater_kernel(num_target_graphs, num_aux_graphs, alpha, temp,   # static
                        tid_ref,                                  # SMEM (1,) int32 (prefetch)
                        tb_ref, ab_ref,                           # (1,Nt)/(1,Na) int32 batch ids
                        tx_ref, ax_ref,                           # (Nt,Din)/(Na,Din) node feats
                        w_ref,                                    # (Din,H) linear weight (no bias)
                        q_all_ref, q_sq_ref, ta_all_ref,          # (T,H) / (T,1) / (T,1)
                        out_ref):                                 # (1, OUT_LANES)
    tid = tid_ref[0]

    def pool_embed_norm(batch_ref, x_ref, num_graphs):
        n = x_ref.shape[0]                           # static num nodes
        batch = batch_ref[...]                       # (1, N) int32
        gid = lax.broadcasted_iota(jnp.int32, (num_graphs, n), 0)
        onehot = (batch == gid).astype(jnp.float32)  # (G, N) mean-pool selector
        counts = jnp.maximum(jnp.sum(onehot, axis=1, keepdims=True), 1.0)
        s = onehot / counts                          # row-normalized (mean pool)
        # reassociated: (S @ X) @ W
        pooled = jnp.dot(
            jnp.dot(s, x_ref[...], preferred_element_type=jnp.float32),
            w_ref[...], preferred_element_type=jnp.float32)      # (G, H)
        nrm = jnp.sqrt(jnp.sum(pooled * pooled, axis=-1, keepdims=True))
        return pooled / jnp.maximum(nrm, EPS)        # L2-normalized graph embeddings

    t_emb = pool_embed_norm(tb_ref, tx_ref, num_target_graphs)   # (Gt, H)
    a_emb = pool_embed_norm(ab_ref, ax_ref, num_aux_graphs)      # (Ga, H)

    # Select per-task constants with a one-hot reduce (no dynamic VMEM slicing).
    T = q_all_ref.shape[0]
    row = lax.broadcasted_iota(jnp.int32, (T, 1), 0)
    sel = (row == tid).astype(jnp.float32)                       # (T, 1)
    q_t = q_all_ref[0:1, :]                                      # structure_pool[0] query
    q_a = jnp.sum(sel * q_all_ref[...], axis=0, keepdims=True)   # structure_pool[task_id]
    q_t_sq = q_sq_ref[0:1, :]                                    # (1,1) precomputed |q|^2
    q_a_sq = jnp.sum(sel * q_sq_ref[...], axis=0, keepdims=True)
    task_aff = jnp.sum(sel * ta_all_ref[...], axis=0, keepdims=True)  # (1,1), precomputed

    def set2set_norm(emb, q, q_sq):
        # Set2Set, processing_steps=1, single set: q comes from LSTM biases only
        # (q_star and hidden state are zero on the first/only step).
        e = jnp.sum(emb * q, axis=-1, keepdims=True)             # (G, 1)
        e = e - jnp.max(e, axis=0, keepdims=True)
        a = jnp.exp(e)
        a = a / jnp.sum(a, axis=0, keepdims=True)                # softmax over the set
        r = jnp.sum(a * emb, axis=0, keepdims=True)              # (1, H) attention readout
        # q_star = concat([q, r]); L2-normalize the concat without materializing it:
        n = jnp.maximum(jnp.sqrt(q_sq + jnp.sum(r * r, axis=-1, keepdims=True)), EPS)
        inv = 1.0 / n
        return q * inv, r * inv

    qt_n, rt_n = set2set_norm(t_emb, q_t, q_t_sq)
    qa_n, ra_n = set2set_norm(a_emb, q_a, q_a_sq)
    structure_aff = (jnp.sum(qt_n * qa_n, axis=-1, keepdims=True) +
                     jnp.sum(rt_n * ra_n, axis=-1, keepdims=True))    # (1, 1)

    mix = jax.nn.sigmoid(((1.0 - alpha) * task_aff + alpha * structure_aff) / temp)
    ta = jax.nn.sigmoid(task_aff)
    sa = jax.nn.sigmoid(structure_aff)

    lane = lax.broadcasted_iota(jnp.int32, (1, OUT_LANES), 1)
    out_ref[...] = jnp.where(lane == 0, mix,
                             jnp.where(lane == 1, ta,
                                       jnp.where(lane == 2, sa, 0.0)))


@functools.partial(jax.jit,
                   static_argnames=("num_target_graphs", "num_aux_graphs", "alpha", "temp"))
def gater_forward(target_x, aux_x, target_batch, aux_batch, task_id,
                  w, q_all, q_sq, task_aff_all, *,
                  num_target_graphs, num_aux_graphs, alpha, temp):
    Nt, Din = target_x.shape
    Na = aux_x.shape[0]
    H = w.shape[1]
    T = q_all.shape[0]

    tb = target_batch.reshape(1, Nt).astype(jnp.int32)
    ab = aux_batch.reshape(1, Na).astype(jnp.int32)
    tid = jnp.asarray(task_id, jnp.int32).reshape(1)

    # index_maps receive (grid idx, *scalar-prefetch refs)
    full = lambda shp: pl.BlockSpec(shp, lambda i, tid_ref: (0, 0))

    out = pl.pallas_call(
        functools.partial(_fused_gater_kernel,
                          num_target_graphs, num_aux_graphs, float(alpha), float(temp)),
        out_shape=jax.ShapeDtypeStruct((1, OUT_LANES), jnp.float32),
        grid_spec=pltpu.PrefetchScalarGridSpec(
            num_scalar_prefetch=1,
            grid=(1,),
            in_specs=[full((1, Nt)), full((1, Na)),       # batch vectors
                      full((Nt, Din)), full((Na, Din)),   # node features
                      full((Din, H)),                     # linear weight
                      full((T, H)), full((T, 1)), full((T, 1))],
            out_specs=pl.BlockSpec((1, OUT_LANES), lambda i, tid_ref: (0, 0))),
        compiler_params=pltpu.CompilerParams(dimension_semantics=("arbitrary",)),
    )(tid, tb, ab,
      target_x.astype(jnp.float32), aux_x.astype(jnp.float32),
      w, q_all, q_sq, task_aff_all)

    # torch shapes: mix (1,), task-affinity sigmoid scalar, structure-affinity sigmoid (1,)
    return out[0, 0:1], out[0, 1], out[0, 2:3]


# ---------------------------------------------------------------------------
# GaterWrapper: parameter setup + constant hoisting in __init__, fused Pallas hot path.
# ---------------------------------------------------------------------------
class GaterWrapperPallas:
    def __init__(self, input_size, hidden_size, num_tasks,
                 gate_temp=0.1, mix_alpha=0.1, key=None):
        self.input_size = input_size
        self.hidden_size = hidden_size
        self.num_tasks = num_tasks
        self.temp = float(gate_temp)
        self.alpha = float(mix_alpha)
        key = jax.random.PRNGKey(0) if key is None else key
        k1, k2, k3, k4 = jax.random.split(key, 4)

        # task_embedding: orthogonal init (rows orthonormal since num_tasks <= hidden),
        # then rows[1:] copied from row 1 (as in MixGate.__init__).
        q_mat, _ = jnp.linalg.qr(jax.random.normal(k1, (hidden_size, num_tasks),
                                                   dtype=jnp.float32))
        te = q_mat.T  # (num_tasks, hidden)
        if num_tasks > 1:
            te = te.at[1:].set(te[1])
        self.task_embedding = te
        # hoisted: L2-normalized rows and the per-task task-affinity <te_n[0], te_n[t]>
        te_n = te / jnp.maximum(jnp.linalg.norm(te, axis=-1, keepdims=True), EPS)
        self.task_aff_all = (te_n @ te_n[0:1].T).astype(jnp.float32)   # (num_tasks, 1)

        # structure_embeddings: Linear(input_size, hidden_size, bias=False)
        bound = 1.0 / jnp.sqrt(input_size)
        self.w = jax.random.uniform(k2, (input_size, hidden_size),
                                    minval=-bound, maxval=bound, dtype=jnp.float32)

        # Set2Set per task: only LSTM biases matter on the first processing step
        # (q_star and hidden are zero), so q = o * tanh(i * g), gates from biases.
        # PyTorch LSTM gate order: i, f, g, o.
        hb = 1.0 / jnp.sqrt(hidden_size)
        b_ih = jax.random.uniform(k3, (num_tasks, 4 * hidden_size),
                                  minval=-hb, maxval=hb, dtype=jnp.float32)
        b_hh = jax.random.uniform(k4, (num_tasks, 4 * hidden_size),
                                  minval=-hb, maxval=hb, dtype=jnp.float32)
        g = b_ih + b_hh
        H = hidden_size
        i_g = jax.nn.sigmoid(g[:, 0:H])
        g_g = jnp.tanh(g[:, 2 * H:3 * H])
        o_g = jax.nn.sigmoid(g[:, 3 * H:4 * H])
        self.q_all = o_g * jnp.tanh(i_g * g_g)                         # (num_tasks, hidden)
        self.q_sq = jnp.sum(self.q_all * self.q_all, axis=-1, keepdims=True)  # (num_tasks, 1)

    def forward(self, x, task_id, *, target_x, target_batch_data, aux_batch_data,
                num_target_graphs=None, num_aux_graphs=None):
        aux_x = x
        # Static graph counts avoid a device->host sync; fall back only if not provided.
        if num_target_graphs is None:
            num_target_graphs = int(jnp.max(target_batch_data)) + 1   # host sync (slow path)
        if num_aux_graphs is None:
            num_aux_graphs = int(jnp.max(aux_batch_data)) + 1         # host sync (slow path)
        return gater_forward(target_x, aux_x, target_batch_data, aux_batch_data,
                             jnp.int32(task_id),
                             self.w, self.q_all, self.q_sq, self.task_aff_all,
                             num_target_graphs=num_target_graphs,
                             num_aux_graphs=num_aux_graphs,
                             alpha=self.alpha, temp=self.temp)


# ---------------------------------------------------------------------------
# Pure-JAX reference (same math, original association / explicit concat).
# ---------------------------------------------------------------------------
def _reference(model, aux_x, task_id, target_x, target_batch, aux_batch, g_t, g_a):
    def normalize(v):
        return v / jnp.maximum(jnp.linalg.norm(v, axis=-1, keepdims=True), EPS)

    def mean_pool_matrix(batch, num_graphs):
        onehot = (batch[None, :] == jnp.arange(num_graphs)[:, None]).astype(jnp.float32)
        counts = jnp.maximum(jnp.sum(onehot, axis=1, keepdims=True), 1.0)
        return onehot / counts

    def pool_norm(x, batch, g):
        s = mean_pool_matrix(batch, g)
        return normalize(s @ (x @ model.w))

    def set2set(emb, q):
        e = jnp.sum(emb * q, axis=-1, keepdims=True)
        a = jax.nn.softmax(e, axis=0)
        r = jnp.sum(a * emb, axis=0, keepdims=True)
        return normalize(jnp.concatenate([q, r], axis=-1))

    t_emb = pool_norm(target_x, target_batch, g_t)
    a_emb = pool_norm(aux_x, aux_batch, g_a)
    st = set2set(t_emb, model.q_all[0:1])
    sa_ = set2set(a_emb, model.q_all[task_id:task_id + 1])
    structure_aff = jnp.sum(st * sa_, axis=-1)                 # (1,)
    te = normalize(model.task_embedding)
    task_aff = jnp.sum(te[0] * te[task_id])                    # scalar
    mix = jax.nn.sigmoid(((1 - model.alpha) * task_aff + model.alpha * structure_aff)
                         / model.temp)
    return mix, jax.nn.sigmoid(task_aff), jax.nn.sigmoid(structure_aff)


if __name__ == "__main__":
    input_size, hidden_size, num_tasks = 32, 32, 3
    n_target_nodes, n_target_graphs = 24, 3
    n_aux_nodes, n_aux_graphs = 40, 5
    task_id = 2

    key = jax.random.PRNGKey(0)
    k_tx, k_ax, k_model = jax.random.split(key, 3)
    target_x = jax.random.normal(k_tx, (n_target_nodes, input_size), dtype=jnp.float32)
    aux_x = jax.random.normal(k_ax, (n_aux_nodes, input_size), dtype=jnp.float32)
    target_batch = jnp.repeat(jnp.arange(n_target_graphs),
                              n_target_nodes // n_target_graphs)
    aux_batch = jnp.repeat(jnp.arange(n_aux_graphs), n_aux_nodes // n_aux_graphs)

    model = GaterWrapperPallas(input_size, hidden_size, num_tasks,
                               gate_temp=0.1, mix_alpha=0.1, key=k_model)

    mix, ta, sa = model.forward(aux_x, task_id,
                                target_x=target_x,
                                target_batch_data=target_batch,
                                aux_batch_data=aux_batch,
                                num_target_graphs=n_target_graphs,
                                num_aux_graphs=n_aux_graphs)
    jax.block_until_ready((mix, ta, sa))

    ref_mix, ref_ta, ref_sa = _reference(model, aux_x, task_id, target_x,
                                         target_batch, aux_batch,
                                         n_target_graphs, n_aux_graphs)
    assert mix.shape == (1,) and sa.shape == (1,) and ta.shape == ()
    assert jnp.allclose(mix, ref_mix, atol=1e-3), (mix, ref_mix)
    assert jnp.allclose(ta, ref_ta, atol=1e-3), (ta, ref_ta)
    assert jnp.allclose(sa, ref_sa, atol=1e-3), (sa, ref_sa)

    print("KERNEL_OK")
</pallas_src>

<mosaic_0001>
module attributes {stable_mosaic.version = 11 : i64} {
  func.func @_fused_gater_kernel(%arg0: i32, %arg1: memref<1xi32, #tpu.memory_space<smem>>, %arg2: memref<1x24xi32, #tpu.memory_space<vmem>>, %arg3: memref<1x40xi32, #tpu.memory_space<vmem>>, %arg4: memref<24x32xf32, #tpu.memory_space<vmem>>, %arg5: memref<40x32xf32, #tpu.memory_space<vmem>>, %arg6: memref<32x32xf32, #tpu.memory_space<vmem>>, %arg7: memref<3x32xf32, #tpu.memory_space<vmem>>, %arg8: memref<3x1xf32, #tpu.memory_space<vmem>>, %arg9: memref<3x1xf32, #tpu.memory_space<vmem>>, %arg10: memref<1x128xf32, #tpu.memory_space<vmem>>) attributes {dimension_semantics = [#tpu.dimension_semantics<arbitrary>], iteration_bounds = array<i64: 1>, scalar_prefetch = 1 : i64, scratch_operands = 0 : i64, tpu.core_type = #tpu.core_type<tc>, window_params = [{pipeline_mode = #tpu.pipeline_mode<synchronous>, transform_indices = @transform_0, window_bounds = array<i64: 1, 24>}, {pipeline_mode = #tpu.pipeline_mode<synchronous>, transform_indices = @transform_1, window_bounds = array<i64: 1, 40>}, {pipeline_mode = #tpu.pipeline_mode<synchronous>, transform_indices = @transform_2, window_bounds = array<i64: 24, 32>}, {pipeline_mode = #tpu.pipeline_mode<synchronous>, transform_indices = @transform_3, window_bounds = array<i64: 40, 32>}, {pipeline_mode = #tpu.pipeline_mode<synchronous>, transform_indices = @transform_4, window_bounds = array<i64: 32, 32>}, {pipeline_mode = #tpu.pipeline_mode<synchronous>, transform_indices = @transform_5, window_bounds = array<i64: 3, 32>}, {pipeline_mode = #tpu.pipeline_mode<synchronous>, transform_indices = @transform_6, window_bounds = array<i64: 3, 1>}, {pipeline_mode = #tpu.pipeline_mode<synchronous>, transform_indices = @transform_7, window_bounds = array<i64: 3, 1>}, {pipeline_mode = #tpu.pipeline_mode<synchronous>, transform_indices = @transform_8, window_bounds = array<i64: 1, 128>}]} {
    %c0 = arith.constant 0 : index
    %0 = memref.load %arg1[%c0] : memref<1xi32, #tpu.memory_space<smem>>
    %c0_0 = arith.constant 0 : index
    %c0_1 = arith.constant 0 : index
    %1 = vector.load %arg2[%c0_0, %c0_1] : memref<1x24xi32, #tpu.memory_space<vmem>>, vector<1x24xi32>
    %2 = tpu.iota {dimensions = array<i32: 0>} : vector<3x24xi32>
    %3 = vector.broadcast %1 : vector<1x24xi32> to vector<3x24xi32>
    %4 = arith.cmpi eq, %3, %2 : vector<3x24xi32>
    %5 = arith.extui %4 : vector<3x24xi1> to vector<3x24xi32>
    %6 = arith.sitofp %5 : vector<3x24xi32> to vector<3x24xf32>
    %cst = arith.constant dense<0.000000e+00> : vector<3xf32>
    %7 = vector.multi_reduction <add>, %6, %cst [1] : vector<3x24xf32> to vector<3xf32>
    %8 = vector.shape_cast %7 : vector<3xf32> to vector<3x1xf32>
    %cst_2 = arith.constant 1.000000e+00 : f32
    %9 = vector.broadcast %cst_2 : f32 to vector<3x1xf32>
    %10 = arith.maximumf %8, %9 : vector<3x1xf32>
    %11 = vector.broadcast %10 : vector<3x1xf32> to vector<3x24xf32>
    %12 = arith.divf %6, %11 : vector<3x24xf32>
    %c0_3 = arith.constant 0 : index
    %c0_4 = arith.constant 0 : index
    %13 = vector.load %arg4[%c0_3, %c0_4] : memref<24x32xf32, #tpu.memory_space<vmem>>, vector<24x32xf32>
    %cst_5 = arith.constant dense<0.000000e+00> : vector<3x32xf32>
    %14 = tpu.matmul %12, %13, %cst_5 {dimension_numbers = #tpu.dot_dimension_numbers<[1], [0], [0], [1], [0, 0, 1, 1], [], []>} : vector<3x24xf32>, vector<24x32xf32>, vector<3x32xf32> -> vector<3x32xf32>
    %c0_6 = arith.constant 0 : index
    %c0_7 = arith.constant 0 : index
    %15 = vector.load %arg6[%c0_6, %c0_7] : memref<32x32xf32, #tpu.memory_space<vmem>>, vector<32x32xf32>
    %cst_8 = arith.constant dense<0.000000e+00> : vector<3x32xf32>
    %16 = tpu.matmul %14, %15, %cst_8 {dimension_numbers = #tpu.dot_dimension_numbers<[1], [0], [0], [1], [0, 0, 1, 1], [], []>} : vector<3x32xf32>, vector<32x32xf32>, vector<3x32xf32> -> vector<3x32xf32>
    %17 = arith.mulf %16, %16 : vector<3x32xf32>
    %cst_9 = arith.constant dense<0.000000e+00> : vector<3xf32>
    %18 = vector.multi_reduction <add>, %17, %cst_9 [1] : vector<3x32xf32> to vector<3xf32>
    %19 = vector.shape_cast %18 : vector<3xf32> to vector<3x1xf32>
    %20 = math.sqrt %19 : vector<3x1xf32>
    %cst_10 = arith.constant 9.99999996E-13 : f32
    %21 = vector.broadcast %cst_10 : f32 to vector<3x1xf32>
    %22 = arith.maximumf %20, %21 : vector<3x1xf32>
    %23 = vector.broadcast %22 : vector<3x1xf32> to vector<3x32xf32>
    %24 = arith.divf %16, %23 : vector<3x32xf32>
    %c0_11 = arith.constant 0 : index
    %c0_12 = arith.constant 0 : index
    %25 = vector.load %arg3[%c0_11, %c0_12] : memref<1x40xi32, #tpu.memory_space<vmem>>, vector<1x40xi32>
    %26 = tpu.iota {dimensions = array<i32: 0>} : vector<5x40xi32>
    %27 = vector.broadcast %25 : vector<1x40xi32> to vector<5x40xi32>
    %28 = arith.cmpi eq, %27, %26 : vector<5x40xi32>
    %29 = arith.extui %28 : vector<5x40xi1> to vector<5x40xi32>
    %30 = arith.sitofp %29 : vector<5x40xi32> to vector<5x40xf32>
    %cst_13 = arith.constant dense<0.000000e+00> : vector<5xf32>
    %31 = vector.multi_reduction <add>, %30, %cst_13 [1] : vector<5x40xf32> to vector<5xf32>
    %32 = vector.shape_cast %31 : vector<5xf32> to vector<5x1xf32>
    %cst_14 = arith.constant 1.000000e+00 : f32
    %33 = vector.broadcast %cst_14 : f32 to vector<5x1xf32>
    %34 = arith.maximumf %32, %33 : vector<5x1xf32>
    %35 = vector.broadcast %34 : vector<5x1xf32> to vector<5x40xf32>
    %36 = arith.divf %30, %35 : vector<5x40xf32>
    %c0_15 = arith.constant 0 : index
    %c0_16 = arith.constant 0 : index
    %37 = vector.load %arg5[%c0_15, %c0_16] : memref<40x32xf32, #tpu.memory_space<vmem>>, vector<40x32xf32>
    %cst_17 = arith.constant dense<0.000000e+00> : vector<5x32xf32>
    %38 = tpu.matmul %36, %37, %cst_17 {dimension_numbers = #tpu.dot_dimension_numbers<[1], [0], [0], [1], [0, 0, 1, 1], [], []>} : vector<5x40xf32>, vector<40x32xf32>, vector<5x32xf32> -> vector<5x32xf32>
    %c0_18 = arith.constant 0 : index
    %c0_19 = arith.constant 0 : index
    %39 = vector.load %arg6[%c0_18, %c0_19] : memref<32x32xf32, #tpu.memory_space<vmem>>, vector<32x32xf32>
    %cst_20 = arith.constant dense<0.000000e+00> : vector<5x32xf32>
    %40 = tpu.matmul %38, %39, %cst_20 {dimension_numbers = #tpu.dot_dimension_numbers<[1], [0], [0], [1], [0, 0, 1, 1], [], []>} : vector<5x32xf32>, vector<32x32xf32>, vector<5x32xf32> -> vector<5x32xf32>
    %41 = arith.mulf %40, %40 : vector<5x32xf32>
    %cst_21 = arith.constant dense<0.000000e+00> : vector<5xf32>
    %42 = vector.multi_reduction <add>, %41, %cst_21 [1] : vector<5x32xf32> to vector<5xf32>
    %43 = vector.shape_cast %42 : vector<5xf32> to vector<5x1xf32>
    %44 = math.sqrt %43 : vector<5x1xf32>
    %cst_22 = arith.constant 9.99999996E-13 : f32
    %45 = vector.broadcast %cst_22 : f32 to vector<5x1xf32>
    %46 = arith.maximumf %44, %45 : vector<5x1xf32>
    %47 = vector.broadcast %46 : vector<5x1xf32> to vector<5x32xf32>
    %48 = arith.divf %40, %47 : vector<5x32xf32>
    %49 = tpu.iota {dimensions = array<i32: 0>} : vector<3x1xi32>
    %50 = vector.broadcast %0 : i32 to vector<3x1xi32>
    %51 = arith.cmpi eq, %49, %50 : vector<3x1xi32>
    %52 = arith.extui %51 : vector<3x1xi1> to vector<3x1xi32>
    %53 = arith.sitofp %52 : vector<3x1xi32> to vector<3x1xf32>
    %c0_23 = arith.constant 0 : index
    %c0_24 = arith.constant 0 : index
    %54 = vector.load %arg7[%c0_23, %c0_24] : memref<3x32xf32, #tpu.memory_space<vmem>>, vector<1x32xf32>
    %c0_25 = arith.constant 0 : index
    %c0_26 = arith.constant 0 : index
    %55 = vector.load %arg7[%c0_25, %c0_26] : memref<3x32xf32, #tpu.memory_space<vmem>>, vector<3x32xf32>
    %56 = vector.broadcast %53 : vector<3x1xf32> to vector<3x32xf32>
    %57 = arith.mulf %56, %55 : vector<3x32xf32>
    %cst_27 = arith.constant dense<0.000000e+00> : vector<32xf32>
    %58 = vector.multi_reduction <add>, %57, %cst_27 [0] : vector<3x32xf32> to vector<32xf32>
    %59 = vector.shape_cast %58 : vector<32xf32> to vector<1x32xf32>
    %c0_28 = arith.constant 0 : index
    %c0_29 = arith.constant 0 : index
    %60 = vector.load %arg8[%c0_28, %c0_29] : memref<3x1xf32, #tpu.memory_space<vmem>>, vector<1x1xf32>
    %c0_30 = arith.constant 0 : index
    %c0_31 = arith.constant 0 : index
    %61 = vector.load %arg8[%c0_30, %c0_31] : memref<3x1xf32, #tpu.memory_space<vmem>>, vector<3x1xf32>
    %62 = arith.mulf %53, %61 : vector<3x1xf32>
    %cst_32 = arith.constant dense<0.000000e+00> : vector<1xf32>
    %63 = vector.multi_reduction <add>, %62, %cst_32 [0] : vector<3x1xf32> to vector<1xf32>
    %64 = vector.shape_cast %63 : vector<1xf32> to vector<1x1xf32>
    %c0_33 = arith.constant 0 : index
    %c0_34 = arith.constant 0 : index
    %65 = vector.load %arg9[%c0_33, %c0_34] : memref<3x1xf32, #tpu.memory_space<vmem>>, vector<3x1xf32>
    %66 = arith.mulf %53, %65 : vector<3x1xf32>
    %cst_35 = arith.constant dense<0.000000e+00> : vector<1xf32>
    %67 = vector.multi_reduction <add>, %66, %cst_35 [0] : vector<3x1xf32> to vector<1xf32>
    %68 = vector.shape_cast %67 : vector<1xf32> to vector<1x1xf32>
    %69 = vector.broadcast %54 : vector<1x32xf32> to vector<3x32xf32>
    %70 = arith.mulf %24, %69 : vector<3x32xf32>
    %cst_36 = arith.constant dense<0.000000e+00> : vector<3xf32>
    %71 = vector.multi_reduction <add>, %70, %cst_36 [1] : vector<3x32xf32> to vector<3xf32>
    %72 = vector.shape_cast %71 : vector<3xf32> to vector<3x1xf32>
    %cst_37 = arith.constant dense<0xFF800000> : vector<1xf32>
    %73 = vector.multi_reduction <maximumf>, %72, %cst_37 [0] : vector<3x1xf32> to vector<1xf32>
    %74 = vector.shape_cast %73 : vector<1xf32> to vector<1x1xf32>
    %75 = vector.broadcast %74 : vector<1x1xf32> to vector<3x1xf32>
    %76 = arith.subf %72, %75 : vector<3x1xf32>
    %77 = math.exp %76 : vector<3x1xf32>
    %cst_38 = arith.constant dense<0.000000e+00> : vector<1xf32>
    %78 = vector.multi_reduction <add>, %77, %cst_38 [0] : vector<3x1xf32> to vector<1xf32>
    %79 = vector.shape_cast %78 : vector<1xf32> to vector<1x1xf32>
    %80 = vector.broadcast %79 : vector<1x1xf32> to vector<3x1xf32>
    %81 = arith.divf %77, %80 : vector<3x1xf32>
    %82 = vector.broadcast %81 : vector<3x1xf32> to vector<3x32xf32>
    %83 = arith.mulf %82, %24 : vector<3x32xf32>
    %cst_39 = arith.constant dense<0.000000e+00> : vector<32xf32>
    %84 = vector.multi_reduction <add>, %83, %cst_39 [0] : vector<3x32xf32> to vector<32xf32>
    %85 = vector.shape_cast %84 : vector<32xf32> to vector<1x32xf32>
    %86 = arith.mulf %85, %85 : vector<1x32xf32>
    %cst_40 = arith.constant dense<0.000000e+00> : vector<1xf32>
    %87 = vector.multi_reduction <add>, %86, %cst_40 [1] : vector<1x32xf32> to vector<1xf32>
    %88 = vector.shape_cast %87 : vector<1xf32> to vector<1x1xf32>
    %89 = arith.addf %60, %88 : vector<1x1xf32>
    %90 = math.sqrt %89 : vector<1x1xf32>
    %cst_41 = arith.constant 9.99999996E-13 : f32
    %91 = vector.broadcast %cst_41 : f32 to vector<1x1xf32>
    %92 = arith.maximumf %90, %91 : vector<1x1xf32>
    %cst_42 = arith.constant 1.000000e+00 : f32
    %93 = vector.broadcast %cst_42 : f32 to vector<1x1xf32>
    %94 = arith.divf %93, %92 : vector<1x1xf32>
    %95 = vector.broadcast %94 : vector<1x1xf32> to vector<1x32xf32>
    %96 = arith.mulf %54, %95 : vector<1x32xf32>
    %97 = vector.broadcast %94 : vector<1x1xf32> to vector<1x32xf32>
    %98 = arith.mulf %85, %97 : vector<1x32xf32>
    %99 = vector.broadcast %59 : vector<1x32xf32> to vector<5x32xf32>
    %100 = arith.mulf %48, %99 : vector<5x32xf32>
    %cst_43 = arith.constant dense<0.000000e+00> : vector<5xf32>
    %101 = vector.multi_reduction <add>, %100, %cst_43 [1] : vector<5x32xf32> to vector<5xf32>
    %102 = vector.shape_cast %101 : vector<5xf32> to vector<5x1xf32>
    %cst_44 = arith.constant dense<0xFF800000> : vector<1xf32>
    %103 = vector.multi_reduction <maximumf>, %102, %cst_44 [0] : vector<5x1xf32> to vector<1xf32>
    %104 = vector.shape_cast %103 : vector<1xf32> to vector<1x1xf32>
    %105 = vector.broadcast %104 : vector<1x1xf32> to vector<5x1xf32>
    %106 = arith.subf %102, %105 : vector<5x1xf32>
    %107 = math.exp %106 : vector<5x1xf32>
    %cst_45 = arith.constant dense<0.000000e+00> : vector<1xf32>
    %108 = vector.multi_reduction <add>, %107, %cst_45 [0] : vector<5x1xf32> to vector<1xf32>
    %109 = vector.shape_cast %108 : vector<1xf32> to vector<1x1xf32>
    %110 = vector.broadcast %109 : vector<1x1xf32> to vector<5x1xf32>
    %111 = arith.divf %107, %110 : vector<5x1xf32>
    %112 = vector.broadcast %111 : vector<5x1xf32> to vector<5x32xf32>
    %113 = arith.mulf %112, %48 : vector<5x32xf32>
    %cst_46 = arith.constant dense<0.000000e+00> : vector<32xf32>
    %114 = vector.multi_reduction <add>, %113, %cst_46 [0] : vector<5x32xf32> to vector<32xf32>
    %115 = vector.shape_cast %114 : vector<32xf32> to vector<1x32xf32>
    %116 = arith.mulf %115, %115 : vector<1x32xf32>
    %cst_47 = arith.constant dense<0.000000e+00> : vector<1xf32>
    %117 = vector.multi_reduction <add>, %116, %cst_47 [1] : vector<1x32xf32> to vector<1xf32>
    %118 = vector.shape_cast %117 : vector<1xf32> to vector<1x1xf32>
    %119 = arith.addf %64, %118 : vector<1x1xf32>
    %120 = math.sqrt %119 : vector<1x1xf32>
    %cst_48 = arith.constant 9.99999996E-13 : f32
    %121 = vector.broadcast %cst_48 : f32 to vector<1x1xf32>
    %122 = arith.maximumf %120, %121 : vector<1x1xf32>
    %cst_49 = arith.constant 1.000000e+00 : f32
    %123 = vector.broadcast %cst_49 : f32 to vector<1x1xf32>
    %124 = arith.divf %123, %122 : vector<1x1xf32>
    %125 = vector.broadcast %124 : vector<1x1xf32> to vector<1x32xf32>
    %126 = arith.mulf %59, %125 : vector<1x32xf32>
    %127 = vector.broadcast %124 : vector<1x1xf32> to vector<1x32xf32>
    %128 = arith.mulf %115, %127 : vector<1x32xf32>
    %129 = arith.mulf %96, %126 : vector<1x32xf32>
    %cst_50 = arith.constant dense<0.000000e+00> : vector<1xf32>
    %130 = vector.multi_reduction <add>, %129, %cst_50 [1] : vector<1x32xf32> to vector<1xf32>
    %131 = vector.shape_cast %130 : vector<1xf32> to vector<1x1xf32>
    %132 = arith.mulf %98, %128 : vector<1x32xf32>
    %cst_51 = arith.constant dense<0.000000e+00> : vector<1xf32>
    %133 = vector.multi_reduction <add>, %132, %cst_51 [1] : vector<1x32xf32> to vector<1xf32>
    %134 = vector.shape_cast %133 : vector<1xf32> to vector<1x1xf32>
    %135 = arith.addf %131, %134 : vector<1x1xf32>
    %cst_52 = arith.constant 0.899999976 : f32
    %136 = vector.broadcast %cst_52 : f32 to vector<1x1xf32>
    %137 = arith.mulf %136, %68 : vector<1x1xf32>
    %cst_53 = arith.constant 1.000000e-01 : f32
    %138 = vector.broadcast %cst_53 : f32 to vector<1x1xf32>
    %139 = arith.mulf %138, %135 : vector<1x1xf32>
    %140 = arith.addf %137, %139 : vector<1x1xf32>
    %cst_54 = arith.constant 1.000000e-01 : f32
    %141 = vector.broadcast %cst_54 : f32 to vector<1x1xf32>
    %142 = arith.divf %140, %141 : vector<1x1xf32>
    %143 = arith.negf %142 : vector<1x1xf32>
    %144 = math.exp %143 : vector<1x1xf32>
    %cst_55 = arith.constant 1.000000e+00 : f32
    %145 = vector.broadcast %cst_55 : f32 to vector<1x1xf32>
    %146 = arith.addf %145, %144 : vector<1x1xf32>
    %147 = arith.divf %145, %146 : vector<1x1xf32>
    %148 = arith.negf %68 : vector<1x1xf32>
    %149 = math.exp %148 : vector<1x1xf32>
    %cst_56 = arith.constant 1.000000e+00 : f32
    %150 = vector.broadcast %cst_56 : f32 to vector<1x1xf32>
    %151 = arith.addf %150, %149 : vector<1x1xf32>
    %152 = arith.divf %150, %151 : vector<1x1xf32>
    %153 = arith.negf %135 : vector<1x1xf32>
    %154 = math.exp %153 : vector<1x1xf32>
    %cst_57 = arith.constant 1.000000e+00 : f32
    %155 = vector.broadcast %cst_57 : f32 to vector<1x1xf32>
    %156 = arith.addf %155, %154 : vector<1x1xf32>
    %157 = arith.divf %155, %156 : vector<1x1xf32>
    %158 = tpu.iota {dimensions = array<i32: 1>} : vector<1x128xi32>
    %c0_i32 = arith.constant 0 : i32
    %159 = vector.broadcast %c0_i32 : i32 to vector<1x128xi32>
    %160 = arith.cmpi eq, %158, %159 : vector<1x128xi32>
    %c1_i32 = arith.constant 1 : i32
    %161 = vector.broadcast %c1_i32 : i32 to vector<1x128xi32>
    %162 = arith.cmpi eq, %158, %161 : vector<1x128xi32>
    %c2_i32 = arith.constant 2 : i32
    %163 = vector.broadcast %c2_i32 : i32 to vector<1x128xi32>
    %164 = arith.cmpi eq, %158, %163 : vector<1x128xi32>
    %cst_58 = arith.constant 0.000000e+00 : f32
    %165 = vector.shape_cast %157 : vector<1x1xf32> to vector<1x1xf32>
    %166 = vector.broadcast %165 : vector<1x1xf32> to vector<1x128xf32>
    %167 = vector.broadcast %cst_58 : f32 to vector<1x128xf32>
    %168 = arith.select %164, %166, %167 : vector<1x128xi1>, vector<1x128xf32>
    %169 = vector.shape_cast %152 : vector<1x1xf32> to vector<1x1xf32>
    %170 = vector.broadcast %169 : vector<1x1xf32> to vector<1x128xf32>
    %171 = arith.select %162, %170, %168 : vector<1x128xi1>, vector<1x128xf32>
    %172 = vector.shape_cast %147 : vector<1x1xf32> to vector<1x1xf32>
    %173 = vector.broadcast %172 : vector<1x1xf32> to vector<1x128xf32>
    %174 = arith.select %160, %173, %171 : vector<1x128xi1>, vector<1x128xf32>
    %c0_59 = arith.constant 0 : index
    %c0_60 = arith.constant 0 : index
    %175 = vector.load %arg10[%c0_59, %c0_60] : memref<1x128xf32, #tpu.memory_space<vmem>>, vector<1x128xf32>
    tpu.vector_store %arg10[%c0_59, %c0_60], %174 {strides = array<i32>} : memref<1x128xf32, #tpu.memory_space<vmem>>, vector<1x128xf32>,
    return
  }
  func.func @transform_0(%arg0: i32, %arg1: memref<1xi32, #tpu.memory_space<smem>>) -> (i32, i32) {
    %c0_i32 = arith.constant 0 : i32
    %c0_i32_0 = arith.constant 0 : i32
    %c0_i32_1 = arith.constant 0 : i32
    return %c0_i32, %c0_i32_0 : i32, i32
  }
  func.func @transform_1(%arg0: i32, %arg1: memref<1xi32, #tpu.memory_space<smem>>) -> (i32, i32) {
    %c0_i32 = arith.constant 0 : i32
    %c0_i32_0 = arith.constant 0 : i32
    %c0_i32_1 = arith.constant 0 : i32
    return %c0_i32, %c0_i32_0 : i32, i32
  }
  func.func @transform_2(%arg0: i32, %arg1: memref<1xi32, #tpu.memory_space<smem>>) -> (i32, i32) {
    %c0_i32 = arith.constant 0 : i32
    %c0_i32_0 = arith.constant 0 : i32
    %c0_i32_1 = arith.constant 0 : i32
    return %c0_i32, %c0_i32_0 : i32, i32
  }
  func.func @transform_3(%arg0: i32, %arg1: memref<1xi32, #tpu.memory_space<smem>>) -> (i32, i32) {
    %c0_i32 = arith.constant 0 : i32
    %c0_i32_0 = arith.constant 0 : i32
    %c0_i32_1 = arith.constant 0 : i32
    return %c0_i32, %c0_i32_0 : i32, i32
  }
  func.func @transform_4(%arg0: i32, %arg1: memref<1xi32, #tpu.memory_space<smem>>) -> (i32, i32) {
    %c0_i32 = arith.constant 0 : i32
    %c0_i32_0 = arith.constant 0 : i32
    %c0_i32_1 = arith.constant 0 : i32
    return %c0_i32, %c0_i32_0 : i32, i32
  }
  func.func @transform_5(%arg0: i32, %arg1: memref<1xi32, #tpu.memory_space<smem>>) -> (i32, i32) {
    %c0_i32 = arith.constant 0 : i32
    %c0_i32_0 = arith.constant 0 : i32
    %c0_i32_1 = arith.constant 0 : i32
    return %c0_i32, %c0_i32_0 : i32, i32
  }
  func.func @transform_6(%arg0: i32, %arg1: memref<1xi32, #tpu.memory_space<smem>>) -> (i32, i32) {
    %c0_i32 = arith.constant 0 : i32
    %c0_i32_0 = arith.constant 0 : i32
    %c0_i32_1 = arith.constant 0 : i32
    return %c0_i32, %c0_i32_0 : i32, i32
  }
  func.func @transform_7(%arg0: i32, %arg1: memref<1xi32, #tpu.memory_space<smem>>) -> (i32, i32) {
    %c0_i32 = arith.constant 0 : i32
    %c0_i32_0 = arith.constant 0 : i32
    %c0_i32_1 = arith.constant 0 : i32
    return %c0_i32, %c0_i32_0 : i32, i32
  }
  func.func @transform_8(%arg0: i32, %arg1: memref<1xi32, #tpu.memory_space<smem>>) -> (i32, i32) {
    %c0_i32 = arith.constant 0 : i32
    %c0_i32_0 = arith.constant 0 : i32
    %c0_i32_1 = arith.constant 0 : i32
    return %c0_i32, %c0_i32_0 : i32, i32
  }
}

</mosaic_0001>

<bundles_post_ra>
// kernel: gater_forward.1
= control target key start
LH: loop header
LB: loop body
LE: loop exit
PB: predicated region body
PF: predicated region fallthrough
CT: control target
= control target key end

     0   :  { %v33_v0 = vlaneseq  ;;  %vm42_vm0 = vcmask 190464   ;;  %v746_v4 = vmov 0.0   ;;  %vm227_vm3 = vcmask 323584   ;;  %s924_s1 = inlined_call_operand.vmem [shape: s32[1,24], index: 1, kind: input, shape index: {}]   ;;  %s925_s2 = inlined_call_operand.vmem [shape: s32[1,40], index: 2, kind: input, shape index: {}]   ;;  %s926_s3 = inlined_call_operand.vmem [shape: f32[24,32], index: 3, kind: input, shape index: {}]   ;;  %s927_s5 = inlined_call_operand.vmem [shape: f32[32,32], index: 5, kind: input, shape index: {}]   ;;  %s928_s4 = inlined_call_operand.vmem [shape: f32[40,32], index: 4, kind: input, shape index: {}]   ;;  %s929_s0 = inlined_call_operand.<no memory space> [shape: s32[1], index: 0, kind: input, shape index: {}]   ;;  %s930_s6 = inlined_call_operand.vmem [shape: f32[3,32], index: 6, kind: input, shape index: {}]   ;;  %s931_s7 = inlined_call_operand.vmem [shape: f32[3,1], index: 7, kind: input, shape index: {}]   ;;  %s932_s8 = inlined_call_operand.vmem [shape: f32[3,1], index: 8, kind: input, shape index: {}]   ;;  %s933_s9 = inlined_call_operand.vmem [shape: f32[1,128], index: 9, kind: output, shape index: {}]  }
   0x1   :  { %v603_v1 = vld [vmem:[%s924_s1] ss:$0 sm:$0xff]  ;;  %v747_v9 = vmov 0.0|0.0   ;;  %v50_v11 = vld [vmem:[%s926_s3 + $0x8] sm:$0xff]  ;;  %vm748_vm4 = vmmov 0   ;;  %v51_v13 = vld [vmem:[%s926_s3 + $0x10] sm:$0xff]  ;;  %v401_v48 = vstv %s929_s0 }
   0x2   :  { %v607_v2 = vld [vmem:[%s925_s2] ss:$0 sm:$0xff]  ;;  %v807_v3 = vshrl.u32 %v33_v0, 7  ;;  %679 = vmatprep.subr.bf16.mxu0 %v747_v9  ;;  %682 = vmatprep.subr.bf16.mxu1 %v747_v9  ;;  %v127_v15 = vld [vmem:[%s927_s5 + $0x8] sm:$0xff]  ;;  %v128_v16 = vld [vmem:[%s927_s5 + $0x10] sm:$0xff]  ;;  %vm52_vm5 = vcmask 195584  }
   0x3   :  { %v49_v10 = vld [vmem:[%s926_s3] sm:$0xff]  ;;  %641 = vmatprep.mubr.msk.f32.mxu0 %vm748_vm4, %v746_v4  ;;  %652 = vmatprep.mubr.msk.f32.mxu1 %vm748_vm4, %v746_v4  ;;  %v129_v18 = vld [vmem:[%s927_s5 + $0x18] sm:$0xff]  ;;  %v235_v25 = vld [vmem:[%s928_s4 + $0x8] sm:$0xff]  ;;  %vm239_vm6 = vcmask 326656   ;;  %vm130_vm7 = vcmask 261120   ;;  %vm205_vm8 = vcmask 256000  }
   0x4   :  { %vm39_vm1 = vcmp.eq.s32.totalorder %v603_v1, %v807_v3  ;;  %vm224_vm2 = vcmp.eq.s32.totalorder %v607_v2, %v807_v3  ;;  %v680_v12 = vpack.c.bf16 %v50_v11, %v49_v10  ;;  %v126_v14 = vld [vmem:[%s927_s5] sm:$0xff]  ;;  %v686_v19 = vpack.c.bf16 %v129_v18, %v128_v16  ;;  %v236_v29 = vld [vmem:[%s928_s4 + $0x10] sm:$0xff]  ;;  %v237_v30 = vld [vmem:[%s928_s4 + $0x18] sm:$0xff] }
   0x5   :  { %v604_v5 = vsel %vm39_vm1, 1.0, %v746_v4  ;;  %v608_v6 = vsel %vm224_vm2, 1.0, %v746_v4  ;;  %v683_v17 = vpack.c.bf16 %v127_v15, %v126_v14  ;;  %v234_v24 = vld [vmem:[%s928_s4] sm:$0xff]  ;;  %v692_v31 = vpack.c.bf16 %v237_v30, %v236_v29 }
   0x6   :  { %v43_v7 = vsel %vm42_vm0, %v604_v5, 0.0  ;;  %v228_v8 = vsel %vm227_vm3, %v608_v6, 0.0  ;;  %681 = vmatpush3.bf16.msra.mxu0 %v680_v12  ;;  %v689_v27 = vpack.c.bf16 %v235_v25, %v234_v24  ;;  %v238_v33 = vld [vmem:[%s928_s4 + $0x20] sm:$0xff]  ;;  %vm387_vm9 = vcmask 258048  }
   0x7   :  { %44 = vadd.xlane.f32.xlu0 %v43_v7  ;;  %639 = vmatprep.subr.mxu0 %v746_v4  ;;  %vm402_vm10 = vcmp.eq.s32.totalorder %v807_v3, %v401_v48  ;;  %v406_v49 = vld [vmem:[%s930_s6] sm:$0x7]  ;;  %v437_v2 = vsub.s32 0, %v807_v3  ;;  %vm443_vm15 = vcmask 1042432   ;;  %vm497_vm0 = vcmask 1044480  }
   0x8   :  { %684 = vmatpush3.bf16.msra.mxu1 %v683_v17  ;;  %v871_v50 = vsel %vm402_vm10, 1.0, %v746_v4  ;;  %vm418_vm1 = vcmask 2048  }
   0x9   :  { %685 = vmatprep.subr.bf16.mxu1 %v747_v9  ;;  %v407_v52 = vmul.f32 %v871_v50, %v406_v49 }
   0xa   :  { %640 = vmatpush3.msra.mxu0 %v51_v13 }
   0xb   :  { %229 = vadd.xlane.f32.xlu0 %v228_v8  ;;  %688 = vmatprep.subr.bf16.mxu0 %v747_v9  ;;  %v408_v57 = vsel %vm205_vm8, %v407_v52, 0.0 }
   0xc   :  { %687 = vmatpush3.bf16.msra.mxu1 %v686_v19  ;;  %v409_v60 = vrot.slane %v408_v57, 4 }
   0xd   :  { %694 = vmatprep.subr.bf16.mxu1 %v747_v9 }
   0xe   :  { %v410_v62 = vadd.f32 %v409_v60, %v408_v57 }
  0x10   :  { %v411_v7 = vrot.slane %v410_v62, 2 }
  0x12   :  { %v412_v12 = vadd.f32 %v411_v7, %v410_v62 }
  0x14   :  { %v413_v3 = vrot.slane %v412_v12, 1 }
  0x16   :  { %v883_v15 = vadd.f32 %v413_v3, %v412_v12 }
  0x94   :  { %v45_v20 = vpop.xlane.xlu0 %44 }
  0x95   :  { %v46_v21 = vmax.f32 %v45_v20, 1.0 }
  0x97   :  { %706 = vrcp.f32 %v46_v21 }
  0x98   :  { %v230_v22 = vpop.xlane.xlu0 %229 }
  0x99   :  { %v231_v23 = vmax.f32 %v230_v22, 1.0 }
  0x9b   :  { %708 = vrcp.f32 %v231_v23 }
  0xa1   :  { %v707_v26 = vpop.eup %706 }
  0xa2   :  { %v48_v28 = vmul.f32 %v707_v26, %v604_v5  ;;  %v879_v5 = vld [vmem:[%s930_s6] sm:$0x1] }
  0xa4   :  { %642 = vmatmul.mubr.msk.f32.vlgmr.msra.gmra.mrb[0].mxu0 %vm52_vm5, %v48_v28 }
  0xa5   :  { %690 = vmatpush3.bf16.msra.mxu0 %v689_v27  ;;  %665 = vmatprep.mubr.msk.f32.mxu0 %vm748_vm4, %v746_v4  ;;  %v709_v32 = vpop.eup %708 }
  0xa6   :  { %691 = vmatprep.subr.bf16.mxu0 %v747_v9  ;;  %v233_v34 = vmul.f32 %v709_v32, %v608_v6 }
  0xa9   :  { %693 = vmatpush3.bf16.msra.mxu0 %v692_v31 }
  0xaa   :  { %663 = vmatprep.subr.mxu0 %v746_v4 }
  0xad   :  { %664 = vmatpush3.msra.mxu0 %v238_v33 }
  0xae   :  { %666 = vmatmul.mubr.msk.f32.vlgmr.msra.gmra.mrb[2].mxu0 %vm239_vm6, %v233_v34  ;;  %vm548_vm6 = vcmask 253952  }
 0x177   :  { %v122_v35 = vpop.f32.mrb[0].mxu0 }
 0x178   :  { %v643_v36 = vpop.f32.mrb[1].mxu0  ;;  %653 = vmatmul.mubr.msk.f32.vlgmr.msra.gmra.mrb[0].mxu1 %vm130_vm7, %v122_v35 }
 0x179   :  { %696 = vmatpush3.bf16.msra.mxu1 %v683_v17  ;;  %676 = vmatprep.mubr.msk.f32.mxu1 %vm748_vm4, %v746_v4 }
 0x17a   :  { %697 = vmatprep.subr.bf16.mxu1 %v747_v9  ;;  %v438_v9 = vrot.slane %v879_v5, %v437_v2 }
 0x17d   :  { %699 = vmatpush3.bf16.msra.mxu1 %v686_v19 }
 0x181   :  { %v309_v37 = vpop.f32.mrb[2].mxu0 }
 0x182   :  { %v667_v38 = vpop.f32.mrb[3].mxu0  ;;  %677 = vmatmul.mubr.msk.f32.vlgmr.msra.gmra.mrb[2].mxu1 %vm130_vm7, %v309_v37 }
 0x24b   :  { %v200_v39 = vpop.f32.mrb[0].mxu1 }
 0x24c   :  { %v654_v40 = vpop.f32.mrb[1].mxu1  ;;  %v204_v41 = vmul.f32 %v200_v39, %v200_v39 }
 0x24e   :  { %v206_v42 = vsel %vm205_vm8, %v204_v41, 0.0 }
 0x24f   :  { %207 = vadd.xlane.f32.xlu1 %v206_v42 }
 0x255   :  { %v382_v43 = vpop.f32.mrb[2].mxu1 }
 0x256   :  { %v386_v44 = vmul.f32 %v382_v43, %v382_v43  ;;  %v678_v45 = vpop.f32.mrb[3].mxu1 }
 0x258   :  { %v388_v46 = vsel %vm387_vm9, %v386_v44, 0.0 }
 0x259   :  { %389 = vadd.xlane.f32.xlu1 %v388_v46 }
 0x2dc   :  { %v208_v47 = vpop.xlane.xlu1 %207 }
 0x2dd   :  { %710 = vrsqrt.f32 %v208_v47  ;;  %vm211_vm11 = vcmp.eq.f32.partialorder %v208_v47, inf  ;;  %v214_v55 = vand.u32 2147483648, %v208_v47  ;;  %vm213_vm12 = vcmp.eq.f32.partialorder %v208_v47, 0.0 }
 0x2e6   :  { %v390_v51 = vpop.xlane.xlu1 %389 }
 0x2e7   :  { %v711_v53 = vpop.eup %710  ;;  %712 = vrsqrt.f32 %v390_v51  ;;  %vm393_vm13 = vcmp.eq.f32.partialorder %v390_v51, inf  ;;  %v396_v1 = vand.u32 2147483648, %v390_v51  ;;  %vm395_vm14 = vcmp.eq.f32.partialorder %v390_v51, 0.0 }
 0x2e8   :  { %v210_v54 = vmul.f32 %v711_v53, %v208_v47 }
 0x2ea   :  { %v212_v56 = vsel %vm211_vm11, %v208_v47, %v210_v54 }
 0x2eb   :  { %v215_v58 = vsel %vm213_vm12, %v214_v55, %v212_v56 }
 0x2ec   :  { %v216_v59 = vmax.f32 %v215_v58, 1e-12 }
 0x2ee   :  { %714 = vrcp.f32 %v216_v59 }
 0x2f1   :  { %v713_v61 = vpop.eup %712 }
 0x2f2   :  { %v392_v63 = vmul.f32 %v713_v61, %v390_v51 }
 0x2f4   :  { %v394_v4 = vsel %vm393_vm13, %v390_v51, %v392_v63 }
 0x2f5   :  { %v397_v6 = vsel %vm395_vm14, %v396_v1, %v394_v4 }
 0x2f6   :  { %v398_v8 = vmax.f32 %v397_v6, 1e-12 }
 0x2f8   :  { %v715_v10 = vpop.eup %714  ;;  %716 = vrcp.f32 %v398_v8 }
 0x2f9   :  { %v218_v11 = vmul.f32 %v715_v10, %v200_v39 }
 0x2fb   :  { %v439_v13 = vmul.f32 %v438_v9, %v218_v11 }
 0x2fd   :  { %v440_v14 = vsel %vm205_vm8, %v439_v13, 0.0 }
 0x2fe   :  { %441 = vadd.xlane.f32.xlu0 %v440_v14 }
 0x302   :  { %v717_v16 = vpop.eup %716 }
 0x303   :  { %v400_v17 = vmul.f32 %v717_v16, %v382_v43 }
 0x305   :  { %v493_v18 = vmul.f32 %v883_v15, %v400_v17 }
 0x307   :  { %v494_v19 = vsel %vm387_vm9, %v493_v18, 0.0 }
 0x308   :  { %495 = vadd.xlane.f32.xlu1 %v494_v19 }
 0x38b   :  { %v442_v20 = vpop.xlane.xlu0 %441 }
 0x38c   :  { %v444_v21 = vsel %vm443_vm15, %v442_v20, -inf }
 0x38d   :  { %v445_v22 = vrot.slane %v444_v21, 4 }
 0x38f   :  { %v446_v23 = vmax.f32 %v444_v21, %v445_v22  ;;  %v416_v21 = vld [vmem:[%s931_s7] sm:$0x7] }
 0x390   :  { %v417_v22 = vmul.f32 %v871_v50, %v416_v21 }
 0x391   :  { %v447_v24 = vrot.slane %v446_v23, 2 }
 0x393   :  { %v448_v25 = vmax.f32 %v446_v23, %v447_v24  ;;  %v419_v23 = vsel %vm418_vm1, %v417_v22, 0.0 }
 0x394   :  { %v420_v24 = vrot.slane %v419_v23, 4 }
 0x395   :  { %v449_v26 = vrot.slane %v448_v25, 1  ;;  %v496_v27 = vpop.xlane.xlu1 %495 }
 0x396   :  { %v498_v28 = vsel %vm497_vm0, %v496_v27, -inf }
 0x397   :  { %v450_v29 = vmax.f32 %v448_v25, %v449_v26  ;;  %v499_v30 = vrot.slane %v498_v28, 4  ;;  %v421_v25 = vadd.f32 %v420_v24, %v419_v23  ;;  %v581_v23 = vand.u32 127, %v33_v0 }
 0x399   :  { %v451_v31 = vsub.f32 %v442_v20, %v450_v29  ;;  %v500_v32 = vmax.f32 %v498_v28, %v499_v30  ;;  %v749_v20 = vmov 0   ;;  %v422_v26 = vrot.slane %v421_v25, 2 }
 0x39a   :  { %704 = vset.pattern.permute.xlu0 %v749_v20  ;;  %705 = vset.pattern.permute.xlu1 %v749_v20 }
 0x39b   :  { %v452_v33 = vmul.f32 1.442695, %v451_v31  ;;  %v501_v34 = vrot.slane %v500_v32, 2  ;;  %v423_v28 = vadd.f32 %v422_v26, %v421_v25 }
 0x39d   :  { %718 = vpow2.f32 %v452_v33  ;;  %v502_v35 = vmax.f32 %v500_v32, %v501_v34  ;;  %v424_v31 = vrot.slane %v423_v28, 1 }
 0x39f   :  { %v503_v36 = vrot.slane %v502_v35, 1  ;;  %v425_v32 = vadd.f32 %v424_v31, %v423_v28 }
 0x3a1   :  { %v504_v37 = vmax.f32 %v502_v35, %v503_v36 }
 0x3a3   :  { %v505_v38 = vsub.f32 %v496_v27, %v504_v37  ;;  %v415_v27 = vld [vmem:[%s931_s7] sm:$0x1] }
 0x3a5   :  { %v506_v39 = vmul.f32 1.442695, %v505_v38 }
 0x3a7   :  { %v719_v40 = vpop.eup %718  ;;  %720 = vpow2.f32 %v506_v39 }
 0x3a8   :  { %v454_v41 = vsel %vm443_vm15, %v719_v40, 0.0 }
 0x3a9   :  { %v455_v42 = vrot.slane %v454_v41, 4 }
 0x3ab   :  { %v456_v43 = vadd.f32 %v455_v42, %v454_v41 }
 0x3ad   :  { %v457_v44 = vrot.slane %v456_v43, 2 }
 0x3af   :  { %v458_v45 = vadd.f32 %v457_v44, %v456_v43 }
 0x3b1   :  { %v721_v46 = vpop.eup %720  ;;  %v459_v47 = vrot.slane %v458_v45, 1 }
 0x3b2   :  { %v508_v48 = vsel %vm497_vm0, %v721_v46, 0.0 }
 0x3b3   :  { %v460_v49 = vadd.f32 %v459_v47, %v458_v45  ;;  %v509_v51 = vrot.slane %v508_v48, 4 }
 0x3b5   :  { %722 = vrcp.f32 %v460_v49  ;;  %v510_v52 = vadd.f32 %v509_v51, %v508_v48  ;;  %v426_v49 = vld [vmem:[%s932_s8] sm:$0x7] }
 0x3b6   :  { %v427_v51 = vmul.f32 %v871_v50, %v426_v49 }
 0x3b7   :  { %v511_v53 = vrot.slane %v510_v52, 2 }
 0x3b9   :  { %v512_v54 = vadd.f32 %v511_v53, %v510_v52  ;;  %v428_v52 = vsel %vm418_vm1, %v427_v51, 0.0 }
 0x3ba   :  { %v429_v53 = vrot.slane %v428_v52, 4 }
 0x3bb   :  { %v513_v55 = vrot.slane %v512_v54, 1 }
 0x3bd   :  { %v514_v56 = vadd.f32 %v513_v55, %v512_v54  ;;  %v430_v54 = vadd.f32 %v429_v53, %v428_v52 }
 0x3bf   :  { %v723_v57 = vpop.eup %722  ;;  %724 = vrcp.f32 %v514_v56  ;;  %v431_v55 = vrot.slane %v430_v54, 2 }
 0x3c0   :  { %v462_v58 = vmul.f32 %v723_v57, %v719_v40 }
 0x3c1   :  { %v432_v56 = vadd.f32 %v431_v55, %v430_v54 }
 0x3c2   :  { %v463_v59 = vmul.f32 %v462_v58, %v218_v11 }
 0x3c3   :  { %v433_v57 = vrot.slane %v432_v56, 1 }
 0x3c4   :  { %v464_v60 = vsel %vm205_vm8, %v463_v59, 0.0  ;;  %vm583_vm8 = vcmp.eq.s32.totalorder %v581_v23, 1 }
 0x3c5   :  { %v465_v61 = vrot.slane %v464_v60, 4  ;;  %v434_v58 = vadd.f32 %v433_v57, %v432_v56 }
 0x3c7   :  { %v466_v62 = vadd.f32 %v465_v61, %v464_v60  ;;  %v613_v59 = vmul.f32 -1.442695, %v434_v58 }
 0x3c9   :  { %v725_v63 = vpop.eup %724  ;;  %v467_v1 = vrot.slane %v466_v62, 2 }
 0x3ca   :  { %v516_v2 = vmul.f32 %v725_v63, %v721_v46 }
 0x3cb   :  { %v468_v4 = vadd.f32 %v467_v1, %v466_v62 }
 0x3cc   :  { %v517_v6 = vmul.f32 %v516_v2, %v400_v17 }
 0x3cd   :  { %v469_v7 = vrot.slane %v468_v4, 1 }
 0x3ce   :  { %v518_v8 = vsel %vm387_vm9, %v517_v6, 0.0  ;;  %vm582_vm9 = vcmp.eq.s32.totalorder %v581_v23, 0 }
 0x3cf   :  { %v893_v9 = vadd.f32 %v469_v7, %v468_v4  ;;  %v519_v10 = vrot.slane %v518_v8, 4 }
 0x3d1   :  { %v471_v12 = vmul.f32 %v893_v9, %v893_v9  ;;  %v520_v13 = vadd.f32 %v519_v10, %v518_v8 }
 0x3d3   :  { %v472_v11 = vsel %vm130_vm7, %v471_v12, 0.0  ;;  %v521_v14 = vrot.slane %v520_v13, 2 }
 0x3d4   :  { %473 = vadd.xlane.f32.xlu0 %v472_v11  ;;  %v557_v11 = vmul.f32 0.9, %v434_v58 }
 0x3d5   :  { %v522_v3 = vadd.f32 %v521_v14, %v520_v13 }
 0x3d7   :  { %v523_v16 = vrot.slane %v522_v3, 1 }
 0x3d9   :  { %v898_v18 = vadd.f32 %v523_v16, %v522_v3 }
 0x3db   :  { %v525_v17 = vmul.f32 %v898_v18, %v898_v18 }
 0x3dd   :  { %v526_v19 = vsel %vm130_vm7, %v525_v17, 0.0  ;;  %vm584_vm7 = vcmp.eq.s32.totalorder %v581_v23, 2 }
 0x3de   :  { %527 = vadd.xlane.f32.xlu1 %v526_v19 }
 0x461   :  { %v474_v29 = vpop.xlane.xlu0 %473 }
 0x462   :  { %v475_v30 = vadd.f32 %v474_v29, %v415_v27 }
 0x464   :  { %726 = vrsqrt.f32 %v475_v30  ;;  %vm478_vm2 = vcmp.eq.f32.partialorder %v475_v30, inf  ;;  %v481_v37 = vand.u32 2147483648, %v475_v30  ;;  %vm480_vm3 = vcmp.eq.f32.partialorder %v475_v30, 0.0 }
 0x46b   :  { %v528_v33 = vpop.xlane.xlu1 %527 }
 0x46c   :  { %v529_v34 = vadd.f32 %v528_v33, %v425_v32 }
 0x46e   :  { %v727_v35 = vpop.eup %726  ;;  %728 = vrsqrt.f32 %v529_v34  ;;  %vm532_vm4 = vcmp.eq.f32.partialorder %v529_v34, inf  ;;  %v535_v43 = vand.u32 2147483648, %v529_v34  ;;  %vm534_vm5 = vcmp.eq.f32.partialorder %v529_v34, 0.0 }
 0x46f   :  { %v477_v36 = vmul.f32 %v727_v35, %v475_v30 }
 0x471   :  { %v479_v38 = vsel %vm478_vm2, %v475_v30, %v477_v36 }
 0x472   :  { %v482_v39 = vsel %vm480_vm3, %v481_v37, %v479_v38 }
 0x473   :  { %v483_v40 = vmax.f32 %v482_v39, 1e-12 }
 0x475   :  { %730 = vrcp.f32 %v483_v40 }
 0x478   :  { %v729_v41 = vpop.eup %728 }
 0x479   :  { %v531_v42 = vmul.f32 %v729_v41, %v529_v34 }
 0x47b   :  { %v533_v44 = vsel %vm532_vm4, %v529_v34, %v531_v42 }
 0x47c   :  { %v536_v45 = vsel %vm534_vm5, %v535_v43, %v533_v44 }
 0x47d   :  { %v537_v46 = vmax.f32 %v536_v45, 1e-12 }
 0x47f   :  { %v731_v47 = vpop.eup %730  ;;  %732 = vrcp.f32 %v537_v46 }
 0x480   :  { %488 = vperm.xlu0 %704, %v731_v47   ;;  %734 = vpow2.f32 %v613_v59 }
 0x489   :  { %v733_v48 = vpop.eup %732 }
 0x48a   :  { %542 = vperm.xlu1 %705, %v733_v48   ;;  %v735_v2 = vpop.eup %734 }
 0x48b   :  { %v571_v10 = vadd.f32 1.0, %v735_v2 }
 0x48d   :  { %736 = vrcp.f32 %v571_v10 }
 0x497   :  { %v737_v12 = vpop.eup %736 }
 0x4ff   :  { %v489_v60 = vpop.permute.xlu0 %488 }
 0x500   :  { %v491_v62 = vmul.f32 %v489_v60, %v879_v5  ;;  %v492_v63 = vmul.f32 %v489_v60, %v893_v9 }
 0x509   :  { %v543_v61 = vpop.permute.xlu1 %542 }
 0x50a   :  { %v545_v1 = vmul.f32 %v543_v61, %v883_v15  ;;  %v546_v50 = vmul.f32 %v543_v61, %v898_v18 }
 0x50c   :  { %v552_v4 = vmul.f32 %v546_v50, %v492_v63  ;;  %v547_v6 = vmul.f32 %v545_v1, %v491_v62 }
 0x50e   :  { %v553_v7 = vsel %vm548_vm6, %v552_v4, 0.0  ;;  %v549_v8 = vsel %vm548_vm6, %v547_v6, 0.0 }
 0x50f   :  { %554 = vadd.xlane.f32.xlu0 %v553_v7  ;;  %550 = vadd.xlane.f32.xlu1 %v549_v8 }
 0x520   :  { %588 = vperm.xlu1 %705, %v737_v12  }
 0x59c   :  { %v555_v13 = vpop.xlane.xlu0 %554  ;;  %v551_v5 = vpop.xlane.xlu1 %550 }
 0x59d   :  { %v556_v9 = vadd.f32 %v555_v13, %v551_v5 }
 0x59f   :  { %v558_v14 = vmul.f32 0.1, %v556_v9  ;;  %v614_v20 = vmul.f32 -1.442695, %v556_v9 }
 0x5a0   :  { %v589_v25 = vpop.permute.xlu1 %588 }
 0x5a1   :  { %v559_v15 = vadd.f32 %v558_v14, %v557_v11 }
 0x5a3   :  { %v612_v3 = vmul.f32 -10.0, %v559_v15 }
 0x5a5   :  { %v563_v16 = vmul.f32 1.442695, %v612_v3 }
 0x5a7   :  { %738 = vpow2.f32 %v563_v16 }
 0x5b1   :  { %v739_v18 = vpop.eup %738 }
 0x5b2   :  { %v565_v17 = vadd.f32 1.0, %v739_v18 }
 0x5b4   :  { %740 = vrcp.f32 %v565_v17 }
 0x5b5   :  { %742 = vpow2.f32 %v614_v20 }
 0x5be   :  { %v741_v19 = vpop.eup %740 }
 0x5bf   :  { %594 = vperm.xlu1 %705, %v741_v19   ;;  %v743_v21 = vpop.eup %742 }
 0x5c0   :  { %v577_v22 = vadd.f32 1.0, %v743_v21 }
 0x5c2   :  { %744 = vrcp.f32 %v577_v22 }
 0x5cc   :  { %v745_v24 = vpop.eup %744 }
 0x5cd   :  { %v585_v26 = vsel %vm584_vm7, %v745_v24, 0.0 }
 0x5ce   :  { %v591_v27 = vsel %vm583_vm8, %v589_v25, %v585_v26 }
 0x63e   :  { %v595_v28 = vpop.permute.xlu1 %594 }
 0x63f   :  { %v597_v29 = vsel %vm582_vm9, %v595_v28, %v591_v27 }
 0x640   :  { %598 = vst [vmem:[%s933_s9] sm:$0x1] %v597_v29 }

</bundles_post_ra>
